<compile_context>
chip_gen: v5e
topology: v5e:2x2
jax: 0.10.0
libtpu: 0.0.40
codegen_flags: <defaults>
</compile_context>

<pallas_src>
import jax
import jax.numpy as jnp
from jax.experimental import pallas as pl
from jax.experimental.pallas import tpu as pltpu


def _l1_sum_kernel(g_ref, t_ref, o_ref, acc_ref):
    """Accumulate sum(|g - t|) for one split of the flattened data.

    g_ref / t_ref : (TILE_ROWS, LANE) sublane-dense tiles of prediction / target.
    o_ref         : (1, 1, 1) per-split partial-sum output.
    acc_ref       : (TILE_ROWS, LANE) f32 VMEM accumulator -- per-step work is pure VALU adds;
                    the cross-lane reduce happens once, at the last step of the split.
    """
    step = pl.program_id(1)

    @pl.when(step == 0)
    def _():
        acc_ref[...] = jnp.zeros_like(acc_ref)

    g = g_ref[...]
    t = t_ref[...]
    # Only upcast when needed (inputs in this module are already f32).
    if g.dtype != jnp.float32:
        g = g.astype(jnp.float32)
    if t.dtype != jnp.float32:
        t = t.astype(jnp.float32)
    acc_ref[...] += jnp.abs(g - t)

    @pl.when(step == pl.num_programs(1) - 1)
    def _():
        o_ref[...] = jnp.sum(acc_ref[...]).reshape(1, 1, 1)


def dcnn_interpolation_loss(inp, target, *, lane=512, tile_rows=256):
    """Compute mean |view(inp, (B,-1)) - target| with a Pallas TPU kernel."""
    B = inp.shape[0]
    G = inp.reshape(B, -1)                     # torch .view(B, -1) equivalent
    D = G.shape[1]
    assert target.shape == (B, D), f"target shape {target.shape} != {(B, D)}"
    N = B * D

    # ---- layout plumbing (free, row-major reshapes) ------------------------------------
    assert lane % 128 == 0
    # Shrink the row tile for tiny inputs (keep it a multiple of 8 sublanes).
    rows_needed = -(-N // lane)
    tile_rows = max(8, min(tile_rows, ((rows_needed + 7) // 8) * 8))
    tile_elems = tile_rows * lane

    g_flat = G.reshape(-1)
    t_flat = target.reshape(-1)
    pad = (-N) % tile_elems
    if pad:
        # Zero-pad BOTH operands: |0 - 0| contributes nothing to the sum.
        g_flat = jnp.pad(g_flat, (0, pad))
        t_flat = jnp.pad(t_flat, (0, pad))
    rows = (N + pad) // lane
    g2 = g_flat.reshape(rows, lane)
    t2 = t_flat.reshape(rows, lane)

    num_tiles = rows // tile_rows
    # Split the streaming reduction across two cores when the tile count allows it
    # (megacore win on v7x; just a sequential outer loop on single-TC chips).
    n_splits = 2 if (num_tiles >= 2 and num_tiles % 2 == 0) else 1
    tiles_per_split = num_tiles // n_splits

    partial = pl.pallas_call(
        _l1_sum_kernel,
        out_shape=jax.ShapeDtypeStruct((n_splits, 1, 1), jnp.float32),
        grid_spec=pltpu.PrefetchScalarGridSpec(
            num_scalar_prefetch=0,
            grid=(n_splits, tiles_per_split),
            in_specs=[
                pl.BlockSpec((tile_rows, lane),
                             lambda s, i: (s * tiles_per_split + i, 0)),
                pl.BlockSpec((tile_rows, lane),
                             lambda s, i: (s * tiles_per_split + i, 0)),
            ],
            out_specs=pl.BlockSpec((1, 1, 1), lambda s, i: (s, 0, 0)),
            scratch_shapes=[pltpu.VMEM((tile_rows, lane), jnp.float32)],
        ),
        compiler_params=pltpu.CompilerParams(
            dimension_semantics=("parallel", "arbitrary"),
        ),
    )(g2, t2)

    # Combine per-split partial sums and apply the mean (divide by the TRUE element count).
    return jnp.sum(partial) * (1.0 / N)


if __name__ == "__main__":
    key = jax.random.PRNGKey(0)
    k_in, k_r1, k_r2 = jax.random.split(key, 3)

    # Small shapes consistent with the module's forward: NCHW input.
    B, C, H, W = 2, 4, 16, 16
    D = C * H * W
    x = jax.random.normal(k_in, (B, C, H, W), dtype=jnp.float32)

    # Deterministic "parameters" from __init__: image responses + interpolation magnitude.
    image1_resp = jax.random.normal(k_r1, (B, D), dtype=jnp.float32)
    image2_resp = jax.random.normal(k_r2, (B, D), dtype=jnp.float32)
    vec_mag = 0.5
    target = image1_resp + vec_mag * (image2_resp - image1_resp)

    loss = dcnn_interpolation_loss(x, target)
    loss = jax.block_until_ready(loss)

    # Pure-JAX reference check (F.l1_loss with default 'mean' reduction).
    ref = jnp.mean(jnp.abs(x.reshape(B, -1) - target))
    assert jnp.allclose(loss, ref, rtol=1e-5, atol=1e-5), (loss, ref)

    print("KERNEL_OK")
</pallas_src>

<mosaic_0001>
module attributes {stable_mosaic.version = 11 : i64} {
  func.func @_l1_sum_kernel(%arg0: i32, %arg1: i32, %arg2: memref<8x512xf32, #tpu.memory_space<vmem>>, %arg3: memref<8x512xf32, #tpu.memory_space<vmem>>, %arg4: memref<1x1x1xf32, #tpu.memory_space<vmem>>, %arg5: memref<8x512xf32, #tpu.memory_space<vmem>>) attributes {dimension_semantics = [#tpu.dimension_semantics<parallel>, #tpu.dimension_semantics<arbitrary>], iteration_bounds = array<i64: 1, 1>, scalar_prefetch = 0 : i64, scratch_operands = 1 : i64, tpu.core_type = #tpu.core_type<tc>, window_params = [{transform_indices = @transform_0, window_bounds = array<i64: 8, 512>}, {transform_indices = @transform_1, window_bounds = array<i64: 8, 512>}, {transform_indices = @transform_2, window_bounds = array<i64: 1, 1, 1>}]} {
    %c0_i32 = arith.constant 0 : i32
    %0 = arith.cmpi eq, %arg1, %c0_i32 : i32
    %1 = arith.extui %0 : i1 to i32
    %c0_i32_0 = arith.constant 0 : i32
    %2 = arith.cmpi ne, %1, %c0_i32_0 : i32
    scf.if %2 {
      %cst = arith.constant 0.000000e+00 : f32
      %13 = vector.broadcast %cst : f32 to vector<8x512xf32>
      %c0_10 = arith.constant 0 : index
      %c0_11 = arith.constant 0 : index
      %14 = vector.load %arg5[%c0_10, %c0_11] : memref<8x512xf32, #tpu.memory_space<vmem>>, vector<8x512xf32>
      tpu.vector_store %arg5[%c0_10, %c0_11], %13 {strides = array<i32>} : memref<8x512xf32, #tpu.memory_space<vmem>>, vector<8x512xf32>,
    } else {
    }
    %c0 = arith.constant 0 : index
    %c0_1 = arith.constant 0 : index
    %3 = vector.load %arg2[%c0, %c0_1] : memref<8x512xf32, #tpu.memory_space<vmem>>, vector<8x512xf32>
    %c0_2 = arith.constant 0 : index
    %c0_3 = arith.constant 0 : index
    %4 = vector.load %arg3[%c0_2, %c0_3] : memref<8x512xf32, #tpu.memory_space<vmem>>, vector<8x512xf32>
    %c0_4 = arith.constant 0 : index
    %c0_5 = arith.constant 0 : index
    %5 = vector.load %arg5[%c0_4, %c0_5] : memref<8x512xf32, #tpu.memory_space<vmem>>, vector<8x512xf32>
    %6 = arith.subf %3, %4 : vector<8x512xf32>
    %7 = math.absf %6 : vector<8x512xf32>
    %8 = arith.addf %5, %7 : vector<8x512xf32>
    %c0_6 = arith.constant 0 : index
    %c0_7 = arith.constant 0 : index
    %9 = vector.load %arg5[%c0_6, %c0_7] : memref<8x512xf32, #tpu.memory_space<vmem>>, vector<8x512xf32>
    tpu.vector_store %arg5[%c0_6, %c0_7], %8 {strides = array<i32>} : memref<8x512xf32, #tpu.memory_space<vmem>>, vector<8x512xf32>,
    %c0_i32_8 = arith.constant 0 : i32
    %10 = arith.cmpi eq, %arg1, %c0_i32_8 : i32
    %11 = arith.extui %10 : i1 to i32
    %c0_i32_9 = arith.constant 0 : i32
    %12 = arith.cmpi ne, %11, %c0_i32_9 : i32
    scf.if %12 {
      %c0_10 = arith.constant 0 : index
      %c0_11 = arith.constant 0 : index
      %13 = vector.load %arg5[%c0_10, %c0_11] : memref<8x512xf32, #tpu.memory_space<vmem>>, vector<8x512xf32>
      %14 = vector.shape_cast %13 : vector<8x512xf32> to vector<1x8x512xf32>
      %cst = arith.constant dense<0.000000e+00> : vector<1xf32>
      %15 = vector.multi_reduction <add>, %14, %cst [1, 2] : vector<1x8x512xf32> to vector<1xf32>
      %16 = vector.shape_cast %15 : vector<1xf32> to vector<1x1x1xf32>
      %17 = vector.extract %16[0, 0, 0] : f32 from vector<1x1x1xf32>
      %18 = vector.broadcast %17 : f32 to vector<1x1x1xf32>
      %c0_12 = arith.constant 0 : index
      %c0_13 = arith.constant 0 : index
      %c0_14 = arith.constant 0 : index
      %19 = vector.load %arg4[%c0_12, %c0_13, %c0_14] : memref<1x1x1xf32, #tpu.memory_space<vmem>>, vector<1x1x1xf32>
      tpu.vector_store %arg4[%c0_12, %c0_13, %c0_14], %18 {strides = array<i32>} : memref<1x1x1xf32, #tpu.memory_space<vmem>>, vector<1x1x1xf32>,
    } else {
    }
    return
  }
  func.func @transform_0(%arg0: i32, %arg1: i32) -> (i32, i32) {
    %c1_i32 = arith.constant 1 : i32
    %0 = arith.muli %arg0, %c1_i32 : i32
    %1 = arith.addi %0, %arg1 : i32
    %c0_i32 = arith.constant 0 : i32
    %c0_i32_0 = arith.constant 0 : i32
    return %1, %c0_i32 : i32, i32
  }
  func.func @transform_1(%arg0: i32, %arg1: i32) -> (i32, i32) {
    %c1_i32 = arith.constant 1 : i32
    %0 = arith.muli %arg0, %c1_i32 : i32
    %1 = arith.addi %0, %arg1 : i32
    %c0_i32 = arith.constant 0 : i32
    %c0_i32_0 = arith.constant 0 : i32
    return %1, %c0_i32 : i32, i32
  }
  func.func @transform_2(%arg0: i32, %arg1: i32) -> (i32, i32, i32) {
    %c0_i32 = arith.constant 0 : i32
    %c0_i32_0 = arith.constant 0 : i32
    %c0_i32_1 = arith.constant 0 : i32
    return %arg0, %c0_i32, %c0_i32_0 : i32, i32, i32
  }
}

</mosaic_0001>

<bundles_post_ra>
// kernel: tpu_custom_call.1
= control target key start
LH: loop header
LB: loop body
LE: loop exit
PB: predicated region body
PF: predicated region fallthrough
CT: control target
= control target key end

     0   :  { %7 = vsyncpa [#allocation4], 0  ;;  %s236_s0 = inlined_call_operand.hbm [shape: f32[8,512], index: 0, kind: input, shape index: {}]   ;;  %s237_s1 = inlined_call_operand.hbm [shape: f32[8,512], index: 1, kind: input, shape index: {}]   ;;  %s238_s2 = inlined_call_operand.hbm [shape: f32[1,1,1], index: 2, kind: output, shape index: {}]  }
   0x1   :  { %8 = vsyncpa [#allocation7], 0 }
   0x2   :  { %9 = vsyncpa [#allocation5], 0  ;;  %s19_s11 = sshll.u32 %s236_s0, 4  ;;  %s209_s12 = smov [#allocation3]   ;;  %s20_s11 = int_to_ptr.hbm [resolvable:$true] %s19_s11 }
   0x3   :  { %s21_s13 = sshll.u32 %s209_s12, 4  ;;  %s34_s16 = sshll.u32 %s237_s1, 4  ;;  %s22_s13 = int_to_ptr.vmem [resolvable:$true] %s21_s13  ;;  %s35_s16 = int_to_ptr.hbm [resolvable:$true] %s34_s16 }
   0x4   :  { %24 = dma.hbm_to_vmem [thread:$0]  %s20_s11, 512, %s22_s13, [#allocation4]  }
   0x5   :  { %s210_s17 = smov [#allocation6]  }
   0x6   :  { %s36_s18 = sshll.u32 %s210_s17, 4  ;;  %s37_s18 = int_to_ptr.vmem [resolvable:$true] %s36_s18 }
   0x7   :  { %39 = dma.hbm_to_vmem [thread:$0]  %s35_s16, 512, %s37_s18, [#allocation7]  }
   0x8   :  { %203 = dma.done.wait [#allocation4], 512  }
   0x9   :  { %204 = vsyncadd [#allocation4], 4294966784 }
   0xa   :  { %205 = dma.done.wait [#allocation7], 512  }
   0xb   :  { %206 = vsyncadd [#allocation7], 4294966784  ;;  %v58_v0 = vld [vmem:[#allocation3] sm:$0xff]  ;;  %v59_v1 = vld [vmem:[#allocation3 + $0x8] sm:$0xff]  ;;  %s211_s0 = smov [#allocation8]   ;;  %s115_s21 = sshll.u32 %s238_s2, 4  ;;  %s116_s21 = int_to_ptr.hbm [resolvable:$true] %s115_s21 }
   0xc   :  { %v60_v2 = vld [vmem:[#allocation3 + $0x10] sm:$0xff]  ;;  %v61_v3 = vld [vmem:[#allocation3 + $0x18] sm:$0xff]  ;;  %v62_v4 = vld [vmem:[#allocation6] sm:$0xff]  ;;  %s113_s1 = sshll.u32 %s211_s0, 4  ;;  %vm106_vm0 = vcmask 0   ;;  %s114_s1 = int_to_ptr.vmem [resolvable:$true] %s113_s1 }
   0xd   :  { %v63_v5 = vld [vmem:[#allocation6 + $0x8] sm:$0xff]  ;;  %v64_v6 = vld [vmem:[#allocation6 + $0x10] sm:$0xff]  ;;  %v65_v7 = vld [vmem:[#allocation6 + $0x18] sm:$0xff]  ;;  %v70_v8 = vsub.f32 %v58_v0, %v62_v4 }
   0xe   :  { %v71_v9 = vsub.f32 %v59_v1, %v63_v5  ;;  %v72_v10 = vsub.f32 %v60_v2, %v64_v6  ;;  %v73_v11 = vsub.f32 %v61_v3, %v65_v7 }
   0xf   :  { %v74_v12 = vand.u32 2147483647, %v70_v8 }
  0x10   :  { %v75_v13 = vand.u32 2147483647, %v71_v9  ;;  %v76_v14 = vand.u32 2147483647, %v72_v10  ;;  %v77_v15 = vand.u32 2147483647, %v73_v11 }
  0x12   :  { %v93_v16 = vadd.f32 %v75_v13, %v74_v12 }
  0x14   :  { %v94_v17 = vadd.f32 %v93_v16, %v76_v14 }
  0x16   :  { %v95_v18 = vadd.f32 %v94_v17, %v77_v15 }
  0x18   :  { %96 = vadd.xlane.f32.xlu0 %v95_v18 }
  0x8b   :  { %v97_v19 = vpop.xlane.xlu0 %96 }
  0x8c   :  { %v98_v20 = vrot.slane %v97_v19, 4 }
  0x8e   :  { %v99_v21 = vadd.f32 %v98_v20, %v97_v19 }
  0x90   :  { %v100_v22 = vrot.slane %v99_v21, 2 }
  0x92   :  { %v101_v23 = vadd.f32 %v100_v22, %v99_v21 }
  0x94   :  { %v102_v24 = vrot.slane %v101_v23, 1 }
  0x96   :  { %v103_v25 = vadd.f32 %v102_v24, %v101_v23 }
  0x98   :  { %126 = vpush %v103_v25 }
  0xc9   :  { %s127_s22 = spop %126 }
  0xca   :  { %v105_v26 = vstv %s127_s22 }
  0xcb   :  { %107 = vst.msk [vmem:[#allocation8] sm:$0x1] %vm106_vm0, %v105_v26 }
  0xcc   :  { %118 = dma.vmem_to_hbm [thread:$0]  %s114_s1, 16, %s116_s21, [#allocation5]  }
  0xcd   :  { %207 = dma.done.wait [#allocation5], 16  }
  0xce   :  { %208 = vsyncadd [#allocation5], 4294967280 }
  0xcf   :  { %123 = vsyncpa [#allocation4], 1 }
  0xd0   :  { %124 = vsyncpa [#allocation7], 1 }
  0xd1   :  { %125 = vsyncpa [#allocation5], 1 }

</bundles_post_ra>
